<compile_context>
chip_gen: v6e
topology: v6e:2x2x1
jax: 0.10.0
libtpu: 0.0.40
codegen_flags: <defaults>
</compile_context>

<pallas_src>
import itertools
import numpy as np
import jax
import jax.numpy as jnp
from jax.experimental import pallas as pl
from jax.experimental.pallas import tpu as pltpu

FEAT_DIM = 1433            # nn.Linear(1433, emb_size) in the module
LAP_DIM = 16               # lap_enc.shape[1]
EMB_SIZE = 64              # emb_size default
K_PACK = FEAT_DIM + LAP_DIM            # 1449 real contraction columns
BIAS_COL = K_PACK                      # column 1449 holds constant 1.0 (bias fold)
K_PAD = 1536               # 1450 -> next multiple of 128 (zero padded, exact)
E_PAD = 128                # 64 -> 128 lane-dense output (zero-padded W columns)
ROW_ALIGN = 64             # row-bucket granularity (multiple of sublane 8)
SINGLE_BLOCK_MAX = 512     # up to this many rows: one block, grid=(1,)
TM_LARGE = 256             # row tile when m > SINGLE_BLOCK_MAX (multi-block path)


# ----------------------------------------------------------------------------
# Pallas kernel: one fused projection  Y = X_packed @ W_packed
#   X_packed columns = [features(1433) | lap_enc(16) | 1.0 | zeros(86)]
#   W_packed rows    = [w_in(1433)     | w_lap(16)   | b_in+b_lap | zeros(86)]
#   W_packed cols    = [emb(64) | zeros(64)]   (lane-dense 128-wide output)
# ----------------------------------------------------------------------------
def _proj_kernel(x_ref, w_ref, o_ref):
    # Pure MXU chain (bias is folded into W via the ones-column of X),
    # f32 accumulate, bf16 cast at the store.
    o_ref[...] = jnp.dot(x_ref[...], w_ref[...],
                         preferred_element_type=jnp.float32).astype(o_ref.dtype)


def packed_projection(x_bf16, w_bf16, *, tm):
    """x: (M_bucket, K_PAD) bf16, w: (K_PAD, E_PAD) bf16 -> (M_bucket, E_PAD) bf16."""
    M, K = x_bf16.shape
    E = w_bf16.shape[1]
    assert M % tm == 0 and K == K_PAD and E == E_PAD
    return pl.pallas_call(
        _proj_kernel,
        out_shape=jax.ShapeDtypeStruct((M, E), jnp.bfloat16),
        grid_spec=pltpu.PrefetchScalarGridSpec(
            num_scalar_prefetch=0,
            grid=(M // tm,),
            in_specs=[
                pl.BlockSpec((tm, K), lambda i: (i, 0)),   # activation tile
                pl.BlockSpec((K, E), lambda i: (0, 0)),    # packed W (resident)
            ],
            out_specs=pl.BlockSpec((tm, E), lambda i: (i, 0)),
        ),
        compiler_params=pltpu.CompilerParams(
            dimension_semantics=("parallel",)),   # multi-block path -> v7x dual-TC
    )(x_bf16, w_bf16)


def _choose_tiling(m):
    """Bucket the data-dependent row count to a small set of static sizes so the
    pallas_call compiles once per bucket, with minimal zero-row padding.

    m <= SINGLE_BLOCK_MAX: one block (grid=(1,)), rows padded to a multiple of
    64 only — no all-zero second tile on single-TC v5e/v6e, no pipeline steps.
    Larger m: TM_LARGE tiles, 'parallel' grid so v7x's two TCs share real rows."""
    if m <= SINGLE_BLOCK_MAX:
        bucket = max(ROW_ALIGN, ((m + ROW_ALIGN - 1) // ROW_ALIGN) * ROW_ALIGN)
        return bucket, bucket
    bucket = ((m + TM_LARGE - 1) // TM_LARGE) * TM_LARGE
    return bucket, TM_LARGE


# ----------------------------------------------------------------------------
# Host-side glue (walk simulation, grouping, gathers)
# ----------------------------------------------------------------------------
# TODO(synk): n2v.simulate_walks (biased node2vec walks over a networkx graph)
# has no Pallas equivalent; it is reproduced as a deterministic numpy random
# walk over a synthetic adjacency list.
def simulate_walks(nodes, adj, walk_length=15, seed=0):
    rng = np.random.RandomState(seed)
    walks = []
    for n in nodes:
        cur = int(n)
        walk = [cur]
        for _ in range(walk_length - 1):
            nbrs = adj[cur]
            cur = int(nbrs[rng.randint(len(nbrs))])
            walk.append(cur)
        walks.append(walk)
    return walks


def build_params(features, lap_enc, w_in, b_in, w_lap, b_lap):
    """One-time packing/padding (done at parameter-setup time, not per forward)."""
    n = features.shape[0]
    # packed activation table: [features | lap | 1.0 | zeros] -> (N, K_PAD), bf16
    ones = jnp.ones((n, 1), features.dtype)
    feat_lap = jnp.concatenate([features, lap_enc, ones], axis=1)      # (N, 1450)
    table_packed = jnp.pad(
        feat_lap, ((0, 0), (0, K_PAD - feat_lap.shape[1]))).astype(jnp.bfloat16)
    # packed weight: [w_in ; w_lap ; (b_in + b_lap) ; zeros] -> (K_PAD, E_PAD), bf16
    w_packed = jnp.concatenate([w_in, w_lap, (b_in + b_lap)[None, :]], axis=0)
    w_packed = jnp.pad(
        w_packed, ((0, K_PAD - w_packed.shape[0]), (0, E_PAD - EMB_SIZE))
    ).astype(jnp.bfloat16)
    return {"table_packed": table_packed, "w_packed": w_packed}


def node2vec_sampler_forward(nodes_np, params, adj, padding_index=0):
    # --- walks + grouping (host, matches the PyTorch forward) ---------------
    walks = simulate_walks(nodes_np, adj, walk_length=15)
    groups = {}
    for w in walks:
        w = [int(x) for x in w]
        groups.setdefault(w[0], []).append(w)
    sorted_walks = list(groups.values())
    samp_neighs = [set(itertools.chain.from_iterable(w)) for w in sorted_walks]
    # sorted() everywhere for deterministic row/column ordering
    unique_nodes_list = sorted(set.union(*samp_neighs))
    samp_neighs_l = [sorted(neighs) for neighs in samp_neighs]
    seq_length = np.array([len(s) for s in samp_neighs_l], dtype=np.int32)
    num_sample = int(seq_length.max())

    unique_idx = jnp.asarray(unique_nodes_list, dtype=jnp.int32)
    nodes_t = jnp.asarray(nodes_np, dtype=jnp.int32)
    n_unique = int(unique_idx.shape[0])
    n_query = int(nodes_t.shape[0])

    # --- ONE gather + ONE fused Pallas projection for both row sets ---------
    all_idx = jnp.concatenate([unique_idx, nodes_t])                 # (U+B,)
    m = n_unique + n_query
    m_bucket, tm = _choose_tiling(m)
    # Pad the INDICES (not the gathered slab): padded slots gather row 0 of the
    # table; their projections land in padded output rows which are sliced off.
    all_idx_padded = jnp.pad(all_idx, (0, m_bucket - m))
    rows = jnp.take(params["table_packed"], all_idx_padded, axis=0)  # (m_bucket, K_PAD) bf16

    proj = packed_projection(rows, params["w_packed"], tm=tm)        # (m_bucket, 128) bf16
    proj = proj[:, :EMB_SIZE]                                        # drop lane pad
    embed_matrix = proj[:n_unique]                                   # (U, 64) bf16
    nodes_emb = proj[n_unique:m]                                     # (B, 64) bf16

    # --- pad neighbor index matrix (== pad_sequence(...).t()) ---------------
    # NOTE: padded slots hold `padding_index` (=0), i.e. they gather row 0 of
    # embed_matrix — identical to the PyTorch behavior; downstream code must
    # apply `padding_mask` to ignore them.
    reverse_index = {unique_nodes_list[x]: x for x in range(len(unique_nodes_list))}
    neigh_idx = [[reverse_index[x] for x in s] for s in samp_neighs_l]
    samp_neighs_t = np.full((len(neigh_idx), num_sample), padding_index, dtype=np.int32)
    for i, s in enumerate(neigh_idx):
        samp_neighs_t[i, :len(s)] = s
    samp_neighs_t = jnp.asarray(samp_neighs_t)

    # index_select + reshape -> (num_groups, num_sample, emb)   (XLA gather glue)
    neighs_emb = jnp.take(embed_matrix, samp_neighs_t.reshape(-1), axis=0)
    neighs_emb = neighs_emb.reshape(-1, num_sample, embed_matrix.shape[1])

    # --- padding mask: trivial elementwise work, plain jnp (no kernel launch)
    col = jnp.arange(1, num_sample + 1, dtype=jnp.int32)[None, :]
    padding_mask = col > jnp.asarray(seq_length)[:, None]

    return nodes_emb, neighs_emb, samp_neighs_t, padding_mask


# ----------------------------------------------------------------------------
# Deterministic parameter / input construction + run
# ----------------------------------------------------------------------------
if __name__ == "__main__":
    num_nodes = 40
    key = jax.random.PRNGKey(0)
    k1, k2, k3, k4, k5, k6 = jax.random.split(key, 6)

    features = jax.random.normal(k1, (num_nodes, FEAT_DIM), jnp.float32)
    lap_enc = jax.random.normal(k2, (num_nodes, LAP_DIM), jnp.float32)
    # nn.Linear(1433, emb) and nn.Linear(lap_dim, emb); weights stored as (in, out)
    w_in = jax.random.normal(k3, (FEAT_DIM, EMB_SIZE), jnp.float32) / np.sqrt(FEAT_DIM)
    b_in = jax.random.normal(k4, (EMB_SIZE,), jnp.float32) * 0.01
    w_lap = jax.random.normal(k5, (LAP_DIM, EMB_SIZE), jnp.float32) / np.sqrt(LAP_DIM)
    b_lap = jax.random.normal(k6, (EMB_SIZE,), jnp.float32) * 0.01

    params = build_params(features, lap_enc, w_in, b_in, w_lap, b_lap)

    # deterministic synthetic graph: ring + skip-3 edges
    adj = {i: [(i - 1) % num_nodes, (i + 1) % num_nodes,
               (i - 3) % num_nodes, (i + 3) % num_nodes] for i in range(num_nodes)}

    nodes = np.array([0, 3, 7, 11, 15, 22, 30, 37], dtype=np.int64)

    nodes_emb, neighs_emb, samp_neighs_t, padding_mask = node2vec_sampler_forward(
        nodes, params, adj, padding_index=0)
    jax.block_until_ready((nodes_emb, neighs_emb, samp_neighs_t, padding_mask))

    # reference check of the Pallas-computed projection on the query nodes.
    # Tolerance because the kernel uses bf16 inputs/weights/output with f32
    # MXU accumulation; rtol covers the output bf16 rounding of large values.
    nodes_raw = jnp.take(features, jnp.asarray(nodes, jnp.int32), axis=0)
    lap_nodes = jnp.take(lap_enc, jnp.asarray(nodes, jnp.int32), axis=0)
    ref = nodes_raw @ w_in + b_in + lap_nodes @ w_lap + b_lap
    np.testing.assert_allclose(np.asarray(nodes_emb.astype(jnp.float32)),
                               np.asarray(ref), rtol=2e-2, atol=2e-2)
    assert nodes_emb.shape == (len(nodes), EMB_SIZE)
    assert neighs_emb.shape[0] == samp_neighs_t.shape[0] == padding_mask.shape[0]
    assert neighs_emb.shape[2] == EMB_SIZE
    assert padding_mask.dtype == jnp.bool_

    print("KERNEL_OK")
</pallas_src>

<mosaic_0001>
module attributes {stable_mosaic.version = 11 : i64} {
  func.func @_proj_kernel(%arg0: i32, %arg1: memref<64x1536xbf16, #tpu.memory_space<vmem>>, %arg2: memref<1536x128xbf16, #tpu.memory_space<vmem>>, %arg3: memref<64x128xbf16, #tpu.memory_space<vmem>>) attributes {dimension_semantics = [#tpu.dimension_semantics<parallel>], iteration_bounds = array<i64: 1>, scalar_prefetch = 0 : i64, scratch_operands = 0 : i64, tpu.core_type = #tpu.core_type<tc>, window_params = [{transform_indices = @transform_0, window_bounds = array<i64: 64, 1536>}, {pipeline_mode = #tpu.pipeline_mode<synchronous>, transform_indices = @transform_1, window_bounds = array<i64: 1536, 128>}, {transform_indices = @transform_2, window_bounds = array<i64: 64, 128>}]} {
    %c0 = arith.constant 0 : index
    %c0_0 = arith.constant 0 : index
    %0 = vector.load %arg1[%c0, %c0_0] : memref<64x1536xbf16, #tpu.memory_space<vmem>>, vector<64x1536xbf16>
    %c0_1 = arith.constant 0 : index
    %c0_2 = arith.constant 0 : index
    %1 = vector.load %arg2[%c0_1, %c0_2] : memref<1536x128xbf16, #tpu.memory_space<vmem>>, vector<1536x128xbf16>
    %cst = arith.constant dense<0.000000e+00> : vector<64x128xf32>
    %2 = tpu.matmul %0, %1, %cst {dimension_numbers = #tpu.dot_dimension_numbers<[1], [0], [0], [1], [0, 0, 1, 1], [], []>} : vector<64x1536xbf16>, vector<1536x128xbf16>, vector<64x128xf32> -> vector<64x128xf32>
    %3 = arith.truncf %2 : vector<64x128xf32> to vector<64x128xbf16>
    %c0_3 = arith.constant 0 : index
    %c0_4 = arith.constant 0 : index
    %4 = vector.load %arg3[%c0_3, %c0_4] : memref<64x128xbf16, #tpu.memory_space<vmem>>, vector<64x128xbf16>
    tpu.vector_store %arg3[%c0_3, %c0_4], %3 {strides = array<i32>} : memref<64x128xbf16, #tpu.memory_space<vmem>>, vector<64x128xbf16>,
    return
  }
  func.func @transform_0(%arg0: i32) -> (i32, i32) {
    %c0_i32 = arith.constant 0 : i32
    %c0_i32_0 = arith.constant 0 : i32
    return %arg0, %c0_i32 : i32, i32
  }
  func.func @transform_1(%arg0: i32) -> (i32, i32) {
    %c0_i32 = arith.constant 0 : i32
    %c0_i32_0 = arith.constant 0 : i32
    %c0_i32_1 = arith.constant 0 : i32
    return %c0_i32, %c0_i32_0 : i32, i32
  }
  func.func @transform_2(%arg0: i32) -> (i32, i32) {
    %c0_i32 = arith.constant 0 : i32
    %c0_i32_0 = arith.constant 0 : i32
    return %arg0, %c0_i32 : i32, i32
  }
}

</mosaic_0001>

<bundles_post_ra>
// kernel: tpu_custom_call.1
= control target key start
LH: loop header
LB: loop body
LE: loop exit
PB: predicated region body
PF: predicated region fallthrough
CT: control target
= control target key end

     0   :  { %7 = vsyncpa [#allocation3], 0  ;;  %s2375_s0 = inlined_call_operand.hbm [shape: bf16[64,1536], index: 0, kind: input, shape index: {}]   ;;  %s2376_s1 = inlined_call_operand.hbm [shape: bf16[1536,128], index: 1, kind: input, shape index: {}]   ;;  %s2377_s2 = inlined_call_operand.hbm [shape: bf16[64,128], index: 2, kind: output, shape index: {}]  }
   0x1   :  { %8 = vsyncpa [#allocation6], 0 }
   0x2   :  { %9 = vsyncpa [#allocation4], 0  ;;  %s2209_s9 = smov [#allocation2]  }
   0x3   :  { %s15_s10 = sshll.u32 %s2209_s9, 4  ;;  %s16_s10 = int_to_ptr.vmem [resolvable:$true] %s15_s10 }
   0x4   :  { %s2151_s11 = scalar_lea.vmem %s16_s10, 6144  ;;  %p2156_p1 = scmp.lt.s32.totalorder %s16_s10, %s16_s10 }
   0x5   :  { %p2152_p0 = scmp.ne.s32.totalorder %s16_s10, %s2151_s11  ;;  %p2157_p2 = scmp.lt.s32.totalorder %s2151_s11, %s2151_s11 }
   0x7   :  { %p2158_p3 = por %p2157_p2, %p2156_p1 }
   0x9   :  { %p2159_p4 = pnand %p2158_p3, %p2152_p0 }
   0xb   :  { %2162 = shalt.err (!%p2159_p4)
}
   0xc   :  { %s2210_s12 = smov 768   ;;  %s2211_s13 = smov 48  }
   0xd   :  { %21 = dma.hbm_to_vmem [thread:$0]  %s2375_s0, 6144, %s16_s10, [#allocation3], %s2210_s12, %s2210_s12, %s2211_s13  }
   0xe   :  { %s2212_s16 = smov [#allocation5]  }
   0xf   :  { %s27_s17 = sshll.u32 %s2212_s16, 4  ;;  %s28_s17 = int_to_ptr.vmem [resolvable:$true] %s27_s17 }
  0x10   :  { %s2171_s18 = scalar_lea.vmem %s28_s17, 12288  ;;  %p2176_p6 = scmp.lt.s32.totalorder %s28_s17, %s28_s17 }
  0x11   :  { %p2172_p5 = scmp.ne.s32.totalorder %s28_s17, %s2171_s18  ;;  %p2177_p7 = scmp.lt.s32.totalorder %s2171_s18, %s2171_s18 }
  0x13   :  { %p2178_p8 = por %p2177_p7, %p2176_p6 }
  0x15   :  { %p2179_p9 = pnand %p2178_p8, %p2172_p5 }
  0x17   :  { %2182 = shalt.err (!%p2179_p9)
}
  0x18   :  { %s2213_s19 = smov 64   ;;  %s2214_s20 = smov 4  }
  0x19   :  { %33 = dma.hbm_to_vmem [thread:$0]  %s2376_s1, 12288, %s28_s17, [#allocation6], %s2213_s19, %s2213_s19, %s2214_s20  }
  0x1a   :  { %2203 = dma.done.wait [#allocation3], 6144  }
  0x1b   :  { %2204 = vsyncadd [#allocation3], 4294961152 }
  0x1c   :  { %2205 = dma.done.wait [#allocation6], 12288  }
  0x1d   :  { %2206 = vsyncadd [#allocation6], 4294955008  ;;  %v1975_v0 = vld [vmem:[#allocation5 + $0x78] sm:$0xff]   ;;  %v1979_v4 = vld [vmem:[#allocation5 + $0x70] sm:$0xff]   ;;  %s2215_s0 = smov [#allocation7]  }
  0x1e   :  { %v1976_v1 = vld [vmem:[#allocation5 + $0xf8] sm:$0xff]   ;;  %1728 = vmatprep.subr.bf16.mxu0 %v1975_v0  ;;  %v1980_v5 = vld [vmem:[#allocation5 + $0xf0] sm:$0xff]   ;;  %v1983_v8 = vld [vmem:[#allocation5 + $0x68] sm:$0xff]   ;;  %s1532_s1 = sshll.u32 %s2215_s0, 4  ;;  %s1533_s1 = int_to_ptr.vmem [resolvable:$true] %s1532_s1 }
  0x1f   :  { %v1977_v2 = vld [vmem:[#allocation5 + $0x38] sm:$0xff]   ;;  %1768 = vmatprep.subr.bf16.mxu1 %v1976_v1  ;;  %v1981_v6 = vld [vmem:[#allocation5 + $0x30] sm:$0xff]   ;;  %v1984_v9 = vld [vmem:[#allocation5 + $0xe8] sm:$0xff]   ;;  %s2183_s23 = scalar_lea.vmem %s1533_s1, 512  ;;  %p2188_p11 = scmp.lt.s32.totalorder %s1533_s1, %s1533_s1 }
  0x20   :  { %v1978_v3 = vld [vmem:[#allocation5 + $0xb8] sm:$0xff]   ;;  %1729 = vmatpush3.bf16.msra.mxu0 %v1977_v2  ;;  %v1982_v7 = vld [vmem:[#allocation5 + $0xb0] sm:$0xff]   ;;  %v1985_v10 = vld [vmem:[#allocation5 + $0x28] sm:$0xff]   ;;  %p2184_p10 = scmp.ne.s32.totalorder %s1533_s1, %s2183_s23  ;;  %p2189_p12 = scmp.lt.s32.totalorder %s2183_s23, %s2183_s23 }
  0x21   :  { %1769 = vmatpush3.bf16.msra.mxu1 %v1978_v3  ;;  %1730 = vmatprep.subr.bf16.mxu0 %v1979_v4  ;;  %v1986_v11 = vld [vmem:[#allocation5 + $0xa8] sm:$0xff]   ;;  %v1987_v12 = vld [vmem:[#allocation5 + $0x60] sm:$0xff]   ;;  %v1991_v16 = vld [vmem:[#allocation5 + $0x58] sm:$0xff]  }
  0x22   :  { %1770 = vmatprep.subr.bf16.mxu1 %v1980_v5  ;;  %v1988_v13 = vld [vmem:[#allocation5 + $0xe0] sm:$0xff]   ;;  %v1992_v17 = vld [vmem:[#allocation5 + $0xd8] sm:$0xff]   ;;  %v1995_v20 = vld [vmem:[#allocation5 + $0x50] sm:$0xff]   ;;  %p2190_p13 = por %p2189_p12, %p2188_p11 }
  0x23   :  { %v1989_v14 = vld [vmem:[#allocation5 + $0x20] sm:$0xff]   ;;  %v1993_v18 = vld [vmem:[#allocation5 + $0x18] sm:$0xff]   ;;  %v1996_v21 = vld [vmem:[#allocation5 + $0xd0] sm:$0xff]  }
  0x24   :  { %1731 = vmatpush3.bf16.msra.mxu0 %v1981_v6  ;;  %v1990_v15 = vld [vmem:[#allocation5 + $0xa0] sm:$0xff]   ;;  %v1994_v19 = vld [vmem:[#allocation5 + $0x98] sm:$0xff]   ;;  %v1997_v22 = vld [vmem:[#allocation5 + $0x10] sm:$0xff]   ;;  %p2191_p0 = pnand %p2190_p13, %p2184_p10 }
  0x25   :  { %1771 = vmatpush3.bf16.msra.mxu1 %v1982_v7  ;;  %1732 = vmatprep.subr.bf16.mxu0 %v1983_v8  ;;  %v1998_v23 = vld [vmem:[#allocation5 + $0x90] sm:$0xff]   ;;  %v1999_v24 = vld [vmem:[#allocation5 + $0x48] sm:$0xff]   ;;  %v2003_v28 = vld [vmem:[#allocation5 + $0x40] sm:$0xff]  }
  0x26   :  { %1772 = vmatprep.subr.bf16.mxu1 %v1984_v9  ;;  %v2000_v25 = vld [vmem:[#allocation5 + $0xc8] sm:$0xff]   ;;  %v2004_v29 = vld [vmem:[#allocation5 + $0xc0] sm:$0xff]   ;;  %v2013_v36 = vld [vmem:[#allocation5 + $0x178] sm:$0xff]  }
  0x27   :  { %v2001_v26 = vld [vmem:[#allocation5 + $0x8] sm:$0xff]   ;;  %v2005_v30 = vld [vmem:[#allocation5] sm:$0xff]   ;;  %v2014_v37 = vld [vmem:[#allocation5 + $0x1f8] sm:$0xff]  }
  0x28   :  { %1733 = vmatpush3.bf16.msra.mxu0 %v1985_v10  ;;  %v2002_v27 = vld [vmem:[#allocation5 + $0x88] sm:$0xff]   ;;  %v2006_v31 = vld [vmem:[#allocation5 + $0x80] sm:$0xff]   ;;  %v2015_v38 = vld [vmem:[#allocation5 + $0x138] sm:$0xff]  }
  0x29   :  { %1773 = vmatpush3.bf16.msra.mxu1 %v1986_v11  ;;  %1734 = vmatprep.subr.bf16.mxu0 %v1987_v12  ;;  %v2007_v32 = vld [vmem:[#allocation2] ss:$48 sps:$4 sm:$0xff]   ;;  %v2009_v33 = vld [vmem:[#allocation2 + $0x4] ss:$48 sps:$4 sm:$0xff]   ;;  %v2010_v34 = vld [vmem:[#allocation2 + $0x8] ss:$48 sps:$4 sm:$0xff]  }
  0x2a   :  { %1774 = vmatprep.subr.bf16.mxu1 %v1988_v13  ;;  %v2012_v35 = vld [vmem:[#allocation2 + $0xc] ss:$48 sps:$4 sm:$0xff]   ;;  %1129 = vmatprep.mubr.bf16.mxu0 %v2009_v33  ;;  %v2017_v40 = vld [vmem:[#allocation5 + $0x170] sm:$0xff]   ;;  %v2026_v47 = vld [vmem:[#allocation2 + $0x68] ss:$48 sps:$4 sm:$0xff]  }
  0x2b   :  { %1194 = vmatprep.mubr.bf16.mxu1 %v2012_v35  ;;  %v2016_v39 = vld [vmem:[#allocation5 + $0x1b8] sm:$0xff]   ;;  %v2018_v41 = vld [vmem:[#allocation5 + $0x1f0] sm:$0xff]   ;;  %v2027_v48 = vld [vmem:[#allocation5 + $0x168] sm:$0xff]  }
  0x2c   :  { %1735 = vmatpush3.bf16.msra.mxu0 %v1989_v14  ;;  %v2019_v42 = vld [vmem:[#allocation5 + $0x130] sm:$0xff]   ;;  %v2023_v45 = vld [vmem:[#allocation2 + $0x6c] ss:$48 sps:$4 sm:$0xff]   ;;  %v2031_v52 = vld [vmem:[#allocation5 + $0x160] sm:$0xff]  }
  0x2d   :  { %1775 = vmatpush3.bf16.msra.mxu1 %v1990_v15  ;;  %1736 = vmatprep.subr.bf16.mxu0 %v1991_v16  ;;  %v2020_v43 = vld [vmem:[#allocation5 + $0x1b0] sm:$0xff]   ;;  %v2028_v49 = vld [vmem:[#allocation5 + $0x1e8] sm:$0xff]   ;;  %v2032_v53 = vld [vmem:[#allocation5 + $0x1e0] sm:$0xff]  }
  0x2e   :  { %1776 = vmatprep.subr.bf16.mxu1 %v1992_v17  ;;  %v2021_v44 = vld [vmem:[#allocation2 + $0x64] ss:$48 sps:$4 sm:$0xff]   ;;  %v2025_v46 = vld [vmem:[#allocation2 + $0x60] ss:$48 sps:$4 sm:$0xff]   ;;  %v2029_v50 = vld [vmem:[#allocation5 + $0x128] sm:$0xff]  }
  0x2f   :  { %v2030_v51 = vld [vmem:[#allocation5 + $0x1a8] sm:$0xff]   ;;  %v2033_v54 = vld [vmem:[#allocation5 + $0x120] sm:$0xff]   ;;  %v2041_v60 = vld [vmem:[#allocation5 + $0x158] sm:$0xff]  }
  0x30   :  { %1737 = vmatpush3.bf16.msra.mxu0 %v1993_v18  ;;  %v2034_v55 = vld [vmem:[#allocation5 + $0x1a0] sm:$0xff]   ;;  %v2037_v57 = vld [vmem:[#allocation2 + $0xcc] ss:$48 sps:$4 sm:$0xff]   ;;  %v2040_v59 = vld [vmem:[#allocation2 + $0xc8] ss:$48 sps:$4 sm:$0xff]  }
  0x31   :  { %1777 = vmatpush3.bf16.msra.mxu1 %v1994_v19  ;;  %1738 = vmatprep.subr.bf16.mxu0 %v1995_v20  ;;  %v2035_v56 = vld [vmem:[#allocation2 + $0xc4] ss:$48 sps:$4 sm:$0xff]   ;;  %v2039_v58 = vld [vmem:[#allocation2 + $0xc0] ss:$48 sps:$4 sm:$0xff]   ;;  %v2042_v61 = vld [vmem:[#allocation5 + $0x1d8] sm:$0xff]  }
  0x32   :  { %1778 = vmatprep.subr.bf16.mxu1 %v1996_v21  ;;  %v2043_v62 = vld [vmem:[#allocation5 + $0x118] sm:$0xff]   ;;  %v2045_v0 = vld [vmem:[#allocation5 + $0x150] sm:$0xff]   ;;  %v2055_v8 = vld [vmem:[#allocation5 + $0x148] sm:$0xff]  }
  0x33   :  { %v2044_v63 = vld [vmem:[#allocation5 + $0x198] sm:$0xff]   ;;  %v2046_v1 = vld [vmem:[#allocation5 + $0x1d0] sm:$0xff]   ;;  %v2056_v9 = vld [vmem:[#allocation5 + $0x1c8] sm:$0xff]  }
  0x34   :  { %1739 = vmatpush3.bf16.msra.mxu0 %v1997_v22  ;;  %v2047_v2 = vld [vmem:[#allocation5 + $0x110] sm:$0xff]   ;;  %v2051_v5 = vld [vmem:[#allocation2 + $0x12c] ss:$48 sps:$4 sm:$0xff]   ;;  %v2054_v7 = vld [vmem:[#allocation2 + $0x128] ss:$48 sps:$4 sm:$0xff]  }
  0x35   :  { %1779 = vmatpush3.bf16.msra.mxu1 %v1998_v23  ;;  %1740 = vmatprep.subr.bf16.mxu0 %v1999_v24  ;;  %v2048_v3 = vld [vmem:[#allocation5 + $0x190] sm:$0xff]   ;;  %v2057_v10 = vld [vmem:[#allocation5 + $0x108] sm:$0xff]   ;;  %v2059_v12 = vld [vmem:[#allocation5 + $0x140] sm:$0xff]  }
  0x36   :  { %1780 = vmatprep.subr.bf16.mxu1 %v2000_v25  ;;  %v2049_v4 = vld [vmem:[#allocation2 + $0x124] ss:$48 sps:$4 sm:$0xff]   ;;  %v2053_v6 = vld [vmem:[#allocation2 + $0x120] ss:$48 sps:$4 sm:$0xff]   ;;  %v2058_v11 = vld [vmem:[#allocation5 + $0x188] sm:$0xff]  }
  0x37   :  { %v2060_v13 = vld [vmem:[#allocation5 + $0x1c0] sm:$0xff]   ;;  %v2066_v18 = vld [vmem:[#allocation2 + $0x18] ss:$48 sps:$4 sm:$0xff]   ;;  %v2068_v19 = vld [vmem:[#allocation2 + $0x1c] ss:$48 sps:$4 sm:$0xff]  }
  0x38   :  { %1741 = vmatpush3.bf16.msra.mxu0 %v2001_v26  ;;  %v2061_v14 = vld [vmem:[#allocation5 + $0x100] sm:$0xff]   ;;  %v2069_v20 = vld [vmem:[#allocation5 + $0x278] sm:$0xff]   ;;  %v2073_v24 = vld [vmem:[#allocation5 + $0x270] sm:$0xff]  }
  0x39   :  { %1781 = vmatpush3.bf16.msra.mxu1 %v2002_v27  ;;  %1742 = vmatprep.subr.bf16.mxu0 %v2003_v28  ;;  %v2062_v15 = vld [vmem:[#allocation5 + $0x180] sm:$0xff]   ;;  %v2070_v21 = vld [vmem:[#allocation5 + $0x2f8] sm:$0xff]   ;;  %v2074_v25 = vld [vmem:[#allocation5 + $0x2f0] sm:$0xff]  }
  0x3a   :  { %1782 = vmatprep.subr.bf16.mxu1 %v2004_v29  ;;  %v2063_v16 = vld [vmem:[#allocation2 + $0x10] ss:$48 sps:$4 sm:$0xff]   ;;  %v2065_v17 = vld [vmem:[#allocation2 + $0x14] ss:$48 sps:$4 sm:$0xff]   ;;  %v2071_v22 = vld [vmem:[#allocation5 + $0x238] sm:$0xff]  }
  0x3b   :  { %v2072_v23 = vld [vmem:[#allocation5 + $0x2b8] sm:$0xff]   ;;  %v2075_v26 = vld [vmem:[#allocation5 + $0x230] sm:$0xff]   ;;  %v2084_v33 = vld [vmem:[#allocation5 + $0x2e8] sm:$0xff]  }
  0x3c   :  { %1743 = vmatpush3.bf16.msra.mxu0 %v2005_v30  ;;  %v2076_v27 = vld [vmem:[#allocation5 + $0x2b0] sm:$0xff]   ;;  %v2079_v29 = vld [vmem:[#allocation2 + $0x7c] ss:$48 sps:$4 sm:$0xff]  }
  0x3d   :  { %1783 = vmatpush3.bf16.msra.mxu1 %v2006_v31  ;;  %1808 = vmatprep.subr.bf16.mxu0 %v2013_v36  ;;  %v2077_v28 = vld [vmem:[#allocation2 + $0x74] ss:$48 sps:$4 sm:$0xff]   ;;  %v2081_v30 = vld [vmem:[#allocation2 + $0x70] ss:$48 sps:$4 sm:$0xff]   ;;  %v2082_v31 = vld [vmem:[#allocation2 + $0x78] ss:$48 sps:$4 sm:$0xff]  }
  0x3e   :  { %1848 = vmatprep.subr.bf16.mxu1 %v2014_v37  ;;  %v2086_v35 = vld [vmem:[#allocation5 + $0x2a8] sm:$0xff]   ;;  %v2087_v36 = vld [vmem:[#allocation5 + $0x260] sm:$0xff]  }
  0x3f   :  { %1130 = vmatmul.mubr.bf16.vlgmr.msra.gmra.mxu0 %v2007_v32  ;;  %v2083_v32 = vld [vmem:[#allocation5 + $0x268] sm:$0xff]   ;;  %v2088_v37 = vld [vmem:[#allocation5 + $0x2e0] sm:$0xff]  }
  0x40   :  { %1195 = vmatmul.mubr.bf16.vlgmr.msra.gmra.mxu1 %v2010_v34  ;;  %1809 = vmatpush3.bf16.msra.mxu0 %v2015_v38  ;;  %v2085_v34 = vld [vmem:[#allocation5 + $0x228] sm:$0xff]   ;;  %v2089_v38 = vld [vmem:[#allocation5 + $0x220] sm:$0xff]  }
  0x41   :  { %1849 = vmatpush3.bf16.msra.mxu1 %v2016_v39  ;;  %1810 = vmatprep.subr.bf16.mxu0 %v2017_v40  ;;  %v2090_v39 = vld [vmem:[#allocation5 + $0x2a0] sm:$0xff]  }
  0x42   :  { %1850 = vmatprep.subr.bf16.mxu1 %v2018_v41  ;;  %1137 = vmatprep.mubr.bf16.mxu0 %v2021_v44  ;;  %v2091_v40 = vld [vmem:[#allocation2 + $0xd4] ss:$48 sps:$4 sm:$0xff]   ;;  %v2093_v41 = vld [vmem:[#allocation2 + $0xdc] ss:$48 sps:$4 sm:$0xff]  }
  0x43   :  { %1202 = vmatprep.mubr.bf16.mxu1 %v2023_v45  ;;  %v2097_v44 = vld [vmem:[#allocation5 + $0x258] sm:$0xff]  }
  0x44   :  { %1811 = vmatpush3.bf16.msra.mxu0 %v2019_v42  ;;  %v2095_v42 = vld [vmem:[#allocation2 + $0xd0] ss:$48 sps:$4 sm:$0xff]   ;;  %v2098_v45 = vld [vmem:[#allocation5 + $0x2d8] sm:$0xff]  }
  0x45   :  { %1851 = vmatpush3.bf16.msra.mxu1 %v2020_v43  ;;  %1812 = vmatprep.subr.bf16.mxu0 %v2027_v48  ;;  %v2096_v43 = vld [vmem:[#allocation2 + $0xd8] ss:$48 sps:$4 sm:$0xff]   ;;  %v2101_v48 = vld [vmem:[#allocation5 + $0x250] sm:$0xff]  }
  0x46   :  { %1852 = vmatprep.subr.bf16.mxu1 %v2028_v49  ;;  %v2102_v49 = vld [vmem:[#allocation5 + $0x2d0] sm:$0xff]  }
  0x47   :  { %1138 = vmatmul.mubr.bf16.gmra.mxu0 %v2025_v46  ;;  %v2099_v46 = vld [vmem:[#allocation5 + $0x218] sm:$0xff]  }
  0x48   :  { %1203 = vmatmul.mubr.bf16.gmra.mxu1 %v2026_v47  ;;  %1813 = vmatpush3.bf16.msra.mxu0 %v2029_v50  ;;  %v2100_v47 = vld [vmem:[#allocation5 + $0x298] sm:$0xff]   ;;  %v2103_v50 = vld [vmem:[#allocation5 + $0x210] sm:$0xff]  }
  0x49   :  { %1853 = vmatpush3.bf16.msra.mxu1 %v2030_v51  ;;  %1814 = vmatprep.subr.bf16.mxu0 %v2031_v52  ;;  %v2104_v51 = vld [vmem:[#allocation5 + $0x290] sm:$0xff]  }
  0x4a   :  { %1854 = vmatprep.subr.bf16.mxu1 %v2032_v53  ;;  %1145 = vmatprep.mubr.bf16.mxu0 %v2035_v56  ;;  %v2105_v52 = vld [vmem:[#allocation2 + $0x134] ss:$48 sps:$4 sm:$0xff]   ;;  %v2107_v53 = vld [vmem:[#allocation2 + $0x13c] ss:$48 sps:$4 sm:$0xff]  }
  0x4b   :  { %1210 = vmatprep.mubr.bf16.mxu1 %v2037_v57  ;;  %v2111_v56 = vld [vmem:[#allocation5 + $0x248] sm:$0xff]  }
  0x4c   :  { %1815 = vmatpush3.bf16.msra.mxu0 %v2033_v54  ;;  %v2109_v54 = vld [vmem:[#allocation2 + $0x130] ss:$48 sps:$4 sm:$0xff]   ;;  %v2112_v57 = vld [vmem:[#allocation5 + $0x2c8] sm:$0xff]  }
  0x4d   :  { %1855 = vmatpush3.bf16.msra.mxu1 %v2034_v55  ;;  %1816 = vmatprep.subr.bf16.mxu0 %v2041_v60  ;;  %v2110_v55 = vld [vmem:[#allocation2 + $0x138] ss:$48 sps:$4 sm:$0xff]   ;;  %v2115_v60 = vld [vmem:[#allocation5 + $0x240] sm:$0xff]  }
  0x4e   :  { %1856 = vmatprep.subr.bf16.mxu1 %v2042_v61  ;;  %v2116_v61 = vld [vmem:[#allocation5 + $0x2c0] sm:$0xff]  }
  0x4f   :  { %1146 = vmatmul.mubr.bf16.gmra.mxu0 %v2039_v58  ;;  %v2113_v58 = vld [vmem:[#allocation5 + $0x208] sm:$0xff]  }
  0x50   :  { %1211 = vmatmul.mubr.bf16.gmra.mxu1 %v2040_v59  ;;  %1817 = vmatpush3.bf16.msra.mxu0 %v2043_v62  ;;  %v2114_v59 = vld [vmem:[#allocation5 + $0x288] sm:$0xff]   ;;  %v2117_v62 = vld [vmem:[#allocation5 + $0x200] sm:$0xff]  }
  0x51   :  { %1857 = vmatpush3.bf16.msra.mxu1 %v2044_v63  ;;  %1818 = vmatprep.subr.bf16.mxu0 %v2045_v0  ;;  %v2118_v63 = vld [vmem:[#allocation5 + $0x280] sm:$0xff]  }
  0x52   :  { %1858 = vmatprep.subr.bf16.mxu1 %v2046_v1  ;;  %1153 = vmatprep.mubr.bf16.mxu0 %v2049_v4  ;;  %v2119_v0 = vld [vmem:[#allocation2 + $0x20] ss:$48 sps:$4 sm:$0xff]   ;;  %v2121_v1 = vld [vmem:[#allocation2 + $0x24] ss:$48 sps:$4 sm:$0xff]  }
  0x53   :  { %1218 = vmatprep.mubr.bf16.mxu1 %v2051_v5  ;;  %v2125_v4 = vld [vmem:[#allocation2 + $0x84] ss:$48 sps:$4 sm:$0xff]   ;;  %v2127_v5 = vld [vmem:[#allocation2 + $0x8c] ss:$48 sps:$4 sm:$0xff]  }
  0x54   :  { %1819 = vmatpush3.bf16.msra.mxu0 %v2047_v2  ;;  %v2122_v2 = vld [vmem:[#allocation2 + $0x28] ss:$48 sps:$4 sm:$0xff]  }
  0x55   :  { %1859 = vmatpush3.bf16.msra.mxu1 %v2048_v3  ;;  %1820 = vmatprep.subr.bf16.mxu0 %v2055_v8  ;;  %v2124_v3 = vld [vmem:[#allocation2 + $0x2c] ss:$48 sps:$4 sm:$0xff]   ;;  %v2131_v8 = vld [vmem:[#allocation2 + $0xe4] ss:$48 sps:$4 sm:$0xff]  }
  0x56   :  { %1860 = vmatprep.subr.bf16.mxu1 %v2056_v9  ;;  %v2133_v9 = vld [vmem:[#allocation2 + $0xec] ss:$48 sps:$4 sm:$0xff]  }
  0x57   :  { %1154 = vmatmul.mubr.bf16.gmra.mxu0 %v2053_v6  ;;  %v2129_v6 = vld [vmem:[#allocation2 + $0x80] ss:$48 sps:$4 sm:$0xff]  }
  0x58   :  { %1219 = vmatmul.mubr.bf16.gmra.mxu1 %v2054_v7  ;;  %1821 = vmatpush3.bf16.msra.mxu0 %v2057_v10  ;;  %v2130_v7 = vld [vmem:[#allocation2 + $0x88] ss:$48 sps:$4 sm:$0xff]   ;;  %v2135_v10 = vld [vmem:[#allocation2 + $0xe0] ss:$48 sps:$4 sm:$0xff]  }
  0x59   :  { %1861 = vmatpush3.bf16.msra.mxu1 %v2058_v11  ;;  %1822 = vmatprep.subr.bf16.mxu0 %v2059_v12  ;;  %v2136_v11 = vld [vmem:[#allocation2 + $0xe8] ss:$48 sps:$4 sm:$0xff]   ;;  %v2137_v12 = vld [vmem:[#allocation2 + $0x144] ss:$48 sps:$4 sm:$0xff]  }
  0x5a   :  { %1862 = vmatprep.subr.bf16.mxu1 %v2060_v13  ;;  %1259 = vmatprep.mubr.bf16.mxu0 %v2065_v17  ;;  %v2139_v13 = vld [vmem:[#allocation2 + $0x14c] ss:$48 sps:$4 sm:$0xff]  }
  0x5b   :  { %1324 = vmatprep.mubr.bf16.mxu1 %v2068_v19 }
  0x5c   :  { %1823 = vmatpush3.bf16.msra.mxu0 %v2061_v14  ;;  %v2141_v14 = vld [vmem:[#allocation2 + $0x140] ss:$48 sps:$4 sm:$0xff]  }
  0x5d   :  { %1863 = vmatpush3.bf16.msra.mxu1 %v2062_v15  ;;  %1888 = vmatprep.subr.bf16.mxu0 %v2069_v20  ;;  %v2142_v15 = vld [vmem:[#allocation2 + $0x148] ss:$48 sps:$4 sm:$0xff]  }
  0x5e   :  { %1928 = vmatprep.subr.bf16.mxu1 %v2070_v21 }
  0x5f   :  { %1260 = vmatmul.mubr.bf16.vlgmr.msra.gmra.mxu0 %v2063_v16 }
  0x60   :  { %1325 = vmatmul.mubr.bf16.vlgmr.msra.gmra.mxu1 %v2066_v18  ;;  %1889 = vmatpush3.bf16.msra.mxu0 %v2071_v22 }
  0x61   :  { %1929 = vmatpush3.bf16.msra.mxu1 %v2072_v23  ;;  %1890 = vmatprep.subr.bf16.mxu0 %v2073_v24 }
  0x62   :  { %1930 = vmatprep.subr.bf16.mxu1 %v2074_v25  ;;  %1267 = vmatprep.mubr.bf16.mxu0 %v2077_v28 }
  0x63   :  { %1332 = vmatprep.mubr.bf16.mxu1 %v2079_v29 }
  0x64   :  { %1891 = vmatpush3.bf16.msra.mxu0 %v2075_v26 }
  0x65   :  { %1931 = vmatpush3.bf16.msra.mxu1 %v2076_v27  ;;  %1892 = vmatprep.subr.bf16.mxu0 %v2083_v32 }
  0x66   :  { %1932 = vmatprep.subr.bf16.mxu1 %v2084_v33 }
  0x67   :  { %1268 = vmatmul.mubr.bf16.gmra.mxu0 %v2081_v30 }
  0x68   :  { %1333 = vmatmul.mubr.bf16.gmra.mxu1 %v2082_v31  ;;  %1893 = vmatpush3.bf16.msra.mxu0 %v2085_v34 }
  0x69   :  { %1933 = vmatpush3.bf16.msra.mxu1 %v2086_v35  ;;  %1894 = vmatprep.subr.bf16.mxu0 %v2087_v36 }
  0x6a   :  { %1934 = vmatprep.subr.bf16.mxu1 %v2088_v37  ;;  %1275 = vmatprep.mubr.bf16.mxu0 %v2091_v40 }
  0x6b   :  { %1340 = vmatprep.mubr.bf16.mxu1 %v2093_v41 }
  0x6c   :  { %1895 = vmatpush3.bf16.msra.mxu0 %v2089_v38 }
  0x6d   :  { %1935 = vmatpush3.bf16.msra.mxu1 %v2090_v39  ;;  %1896 = vmatprep.subr.bf16.mxu0 %v2097_v44 }
  0x6e   :  { %1936 = vmatprep.subr.bf16.mxu1 %v2098_v45 }
  0x6f   :  { %1276 = vmatmul.mubr.bf16.gmra.mxu0 %v2095_v42 }
  0x70   :  { %1341 = vmatmul.mubr.bf16.gmra.mxu1 %v2096_v43  ;;  %1897 = vmatpush3.bf16.msra.mxu0 %v2099_v46 }
  0x71   :  { %1937 = vmatpush3.bf16.msra.mxu1 %v2100_v47  ;;  %1898 = vmatprep.subr.bf16.mxu0 %v2101_v48 }
  0x72   :  { %1938 = vmatprep.subr.bf16.mxu1 %v2102_v49  ;;  %1283 = vmatprep.mubr.bf16.mxu0 %v2105_v52 }
  0x73   :  { %1348 = vmatprep.mubr.bf16.mxu1 %v2107_v53 }
  0x74   :  { %1899 = vmatpush3.bf16.msra.mxu0 %v2103_v50 }
  0x75   :  { %1939 = vmatpush3.bf16.msra.mxu1 %v2104_v51  ;;  %1900 = vmatprep.subr.bf16.mxu0 %v2111_v56 }
  0x76   :  { %1940 = vmatprep.subr.bf16.mxu1 %v2112_v57 }
  0x77   :  { %1284 = vmatmul.mubr.bf16.gmra.mxu0 %v2109_v54 }
  0x78   :  { %1349 = vmatmul.mubr.bf16.gmra.mxu1 %v2110_v55  ;;  %1901 = vmatpush3.bf16.msra.mxu0 %v2113_v58 }
  0x79   :  { %1941 = vmatpush3.bf16.msra.mxu1 %v2114_v59  ;;  %1902 = vmatprep.subr.bf16.mxu0 %v2115_v60 }
  0x7a   :  { %1942 = vmatprep.subr.bf16.mxu1 %v2116_v61  ;;  %1389 = vmatprep.mubr.bf16.mxu0 %v2121_v1 }
  0x7b   :  { %1454 = vmatprep.mubr.bf16.mxu1 %v2124_v3 }
  0x7c   :  { %1903 = vmatpush3.bf16.msra.mxu0 %v2117_v62 }
  0x7d   :  { %1943 = vmatpush3.bf16.msra.mxu1 %v2118_v63 }
  0x7f   :  { %1390 = vmatmul.mubr.bf16.vlgmr.msra.gmra.mxu0 %v2119_v0 }
  0x80   :  { %1455 = vmatmul.mubr.bf16.vlgmr.msra.gmra.mxu1 %v2122_v2  ;;  %1397 = vmatprep.mubr.bf16.mxu0 %v2125_v4 }
  0x81   :  { %1462 = vmatprep.mubr.bf16.mxu1 %v2127_v5 }
  0x87   :  { %1398 = vmatmul.mubr.bf16.gmra.mxu0 %v2129_v6 }
  0x88   :  { %1463 = vmatmul.mubr.bf16.gmra.mxu1 %v2130_v7  ;;  %1405 = vmatprep.mubr.bf16.mxu0 %v2131_v8 }
  0x89   :  { %1470 = vmatprep.mubr.bf16.mxu1 %v2133_v9 }
  0x8f   :  { %1406 = vmatmul.mubr.bf16.gmra.mxu0 %v2135_v10 }
  0x90   :  { %1471 = vmatmul.mubr.bf16.gmra.mxu1 %v2136_v11  ;;  %1413 = vmatprep.mubr.bf16.mxu0 %v2137_v12 }
  0x91   :  { %1478 = vmatprep.mubr.bf16.mxu1 %v2139_v13 }
  0x97   :  { %1414 = vmatmul.mubr.bf16.gmra.mxu0 %v2141_v14 }
  0x98   :  { %1479 = vmatmul.mubr.bf16.gmra.mxu1 %v2142_v15 }
  0xff   :  { %v1744_v16 = vpop.f32.mrf.mxu0 }
 0x100   :  { %v1784_v17 = vpop.f32.mrf.mxu1 }
 0x101   :  { %v1745_v18 = vpop.f32.mrf.mxu0 }
 0x102   :  { %v1785_v19 = vpop.f32.mrf.mxu1  ;;  %v1746_v14 = vadd.f32 %v1745_v18, %v1744_v16 }
 0x103   :  { %v1747_v20 = vpop.f32.mrf.mxu0  ;;  %v1786_v15 = vadd.f32 %v1785_v19, %v1784_v17 }
 0x104   :  { %v1787_v21 = vpop.f32.mrf.mxu1 }
 0x105   :  { %v1748_v22 = vpop.f32.mrf.mxu0 }
 0x106   :  { %v1788_v23 = vpop.f32.mrf.mxu1 }
 0x107   :  { %v2240_v24 = vpop.f32.mrf.mxu0 }
 0x108   :  { %v2242_v25 = vpop.f32.mrf.mxu1 }
 0x109   :  { %v2244_v26 = vpop.f32.mrf.mxu0 }
 0x10a   :  { %v2246_v27 = vpop.f32.mrf.mxu1 }
 0x10b   :  { %v2248_v28 = vpop.f32.mrf.mxu0  ;;  %v1792_v16 = vadd.f32 %v2246_v27, %v2242_v25 }
 0x10c   :  { %v2250_v29 = vpop.f32.mrf.mxu1 }
 0x10d   :  { %v2252_v30 = vpop.f32.mrf.mxu0 }
 0x10e   :  { %v2254_v31 = vpop.f32.mrf.mxu1 }
 0x10f   :  { %v2256_v32 = vpop.f32.mrf.mxu0 }
 0x110   :  { %v2258_v33 = vpop.f32.mrf.mxu1 }
 0x111   :  { %v2260_v34 = vpop.f32.mrf.mxu0 }
 0x112   :  { %v2262_v35 = vpop.f32.mrf.mxu1 }
 0x113   :  { %v2264_v36 = vpop.f32.mrf.mxu0 }
 0x114   :  { %v2266_v37 = vpop.f32.mrf.mxu1 }
 0x115   :  { %v2268_v38 = vpop.f32.mrf.mxu0 }
 0x116   :  { %v2270_v39 = vpop.f32.mrf.mxu1 }
 0x117   :  { %v2272_v40 = vpop.f32.mrf.mxu0 }
 0x118   :  { %v2274_v41 = vpop.f32.mrf.mxu1 }
 0x119   :  { %v2276_v42 = vpop.f32.mrf.mxu0 }
 0x11a   :  { %v2278_v43 = vpop.f32.mrf.mxu1 }
 0x11b   :  { %v2280_v44 = vpop.f32.mrf.mxu0 }
 0x11c   :  { %2378 = vst [vmem:[#allocation11_spill] sm:$0xff] %v2280_v44  ;;  %v2282_v45 = vpop.f32.mrf.mxu1 }
 0x11d   :  { %2379 = vst [vmem:[#allocation12_spill] sm:$0xff] %v2282_v45  ;;  %v2284_v46 = vpop.f32.mrf.mxu0  ;;  %v1789_v45 = vadd.f32 %v1788_v23, %v1787_v21  ;;  %v1795_v23 = vadd.f32 %v2254_v31, %v2250_v29  ;;  %v1758_v29 = vadd.f32 %v2260_v34, %v2256_v32  ;;  %v1798_v31 = vadd.f32 %v2262_v35, %v2258_v33 }
 0x11e   :  { %2380 = vst [vmem:[#allocation13_spill] sm:$0xff] %v2284_v46  ;;  %v2286_v47 = vpop.f32.mrf.mxu1 }
 0x11f   :  { %2381 = vst [vmem:[#allocation14_spill] sm:$0xff] %v2286_v47  ;;  %v1824_v48 = vpop.f32.mrf.mxu0 }
 0x120   :  { %v1864_v49 = vpop.f32.mrf.mxu1 }
 0x121   :  { %v1825_v50 = vpop.f32.mrf.mxu0 }
 0x122   :  { %v1865_v51 = vpop.f32.mrf.mxu1  ;;  %v1826_v46 = vadd.f32 %v1825_v50, %v1824_v48 }
 0x123   :  { %v1827_v52 = vpop.f32.mrf.mxu0  ;;  %v1866_v18 = vadd.f32 %v1865_v51, %v1864_v49 }
 0x124   :  { %v1867_v53 = vpop.f32.mrf.mxu1 }
 0x125   :  { %v1828_v54 = vpop.f32.mrf.mxu0 }
 0x126   :  { %v1868_v55 = vpop.f32.mrf.mxu1  ;;  %v1829_v44 = vadd.f32 %v1828_v54, %v1827_v52 }
 0x127   :  { %v1830_v56 = vpop.f32.mrf.mxu0  ;;  %v1869_v48 = vadd.f32 %v1868_v55, %v1867_v53 }
 0x128   :  { %v2288_v57 = vpop.f32.mrf.mxu1 }
 0x129   :  { %v1831_v58 = vpop.f32.mrf.mxu0 }
 0x12a   :  { %v1871_v59 = vpop.f32.mrf.mxu1  ;;  %v1832_v50 = vadd.f32 %v1831_v58, %v1830_v56 }
 0x12b   :  { %v1833_v60 = vpop.f32.mrf.mxu0  ;;  %v1872_v53 = vadd.f32 %v1871_v59, %v2288_v57  ;;  %v1213_v57 = vadd.f32 %v1798_v31, %v1758_v29 }
 0x12c   :  { %v2290_v61 = vpop.f32.mrf.mxu1 }
 0x12d   :  { %v1834_v62 = vpop.f32.mrf.mxu0 }
 0x12e   :  { %v2292_v63 = vpop.f32.mrf.mxu1  ;;  %v1835_v25 = vadd.f32 %v1834_v62, %v1833_v60 }
 0x12f   :  { %v2294_v0 = vpop.f32.mrf.mxu0  ;;  %v1875_v32 = vadd.f32 %v2292_v63, %v2290_v61 }
 0x130   :  { %v2296_v1 = vpop.f32.mrf.mxu1 }
 0x131   :  { %2382 = vst [vmem:[#allocation15_spill] sm:$0xff] %v2296_v1  ;;  %v2298_v2 = vpop.f32.mrf.mxu0 }
 0x132   :  { %v2300_v3 = vpop.f32.mrf.mxu1  ;;  %v1838_v33 = vadd.f32 %v2298_v2, %v2294_v0  ;;  %v1764_v0 = vadd.f32 %v2276_v42, %v2272_v40  ;;  %v1804_v2 = vadd.f32 %v2278_v43, %v2274_v41 }
 0x133   :  { %2383 = vst [vmem:[#allocation16_spill] sm:$0xff] %v2300_v3  ;;  %v2302_v4 = vpop.f32.mrf.mxu0 }
 0x134   :  { %v2304_v5 = vpop.f32.mrf.mxu1 }
 0x135   :  { %2384 = vst [vmem:[#allocation17_spill] sm:$0xff] %v2304_v5  ;;  %v2306_v6 = vpop.f32.mrf.mxu0  ;;  %v1749_v5 = vadd.f32 %v1748_v22, %v1747_v20  ;;  %v1755_v22 = vadd.f32 %v2252_v30, %v2248_v28 }
 0x136   :  { %v2308_v7 = vpop.f32.mrf.mxu1 }
 0x137   :  { %2385 = vst [vmem:[#allocation18_spill] sm:$0xff] %v2308_v7  ;;  %v2310_v8 = vpop.f32.mrf.mxu0  ;;  %v1200_v3 = vadd.f32 %v1789_v45, %v1749_v5  ;;  %v1208_v51 = vadd.f32 %v1795_v23, %v1755_v22 }
 0x138   :  { %2386 = vst [vmem:[#allocation19_spill] sm:$0xff] %v2310_v8  ;;  %v2312_v9 = vpop.f32.mrf.mxu1  ;;  %v1197_v8 = vadd.f32 %v1786_v15, %v1746_v14  ;;  %v2390_v22 = vld [vmem:[#allocation15_spill] sm:$0xff] }
 0x139   :  { %2387 = vst [vmem:[#allocation20_spill] sm:$0xff] %v2312_v9  ;;  %v2314_v10 = vpop.f32.mrf.mxu0  ;;  %v1265_v19 = vadd.f32 %v1829_v44, %v1200_v3  ;;  %v1273_v56 = vadd.f32 %v1835_v25, %v1208_v51  ;;  %v2394_v25 = vld [vmem:[#allocation12_spill] sm:$0xff] }
 0x13a   :  { %2388 = vst [vmem:[#allocation21_spill] sm:$0xff] %v2314_v10  ;;  %v2316_v11 = vpop.f32.mrf.mxu1  ;;  %v1262_v10 = vadd.f32 %v1826_v46, %v1197_v8  ;;  %v2391_v23 = vld [vmem:[#allocation16_spill] sm:$0xff] }
 0x13b   :  { %2389 = vst [vmem:[#allocation22_spill] sm:$0xff] %v2316_v11  ;;  %v2318_v12 = vpop.f32.mrf.mxu0  ;;  %v1752_v11 = vadd.f32 %v2244_v26, %v2240_v24  ;;  %v1330_v54 = vadd.f32 %v1869_v48, %v1265_v19  ;;  %v1278_v19 = vadd.f32 %v1838_v33, %v1213_v57 }
 0x13c   :  { %v2320_v13 = vpop.f32.mrf.mxu1  ;;  %v1327_v46 = vadd.f32 %v1866_v18, %v1262_v10  ;;  %v2396_v42 = vld [vmem:[#allocation17_spill] sm:$0xff] }
 0x13d   :  { %v2322_v47 = vpop.f32.mrf.mxu0  ;;  %v1205_v24 = vadd.f32 %v1792_v16, %v1752_v11  ;;  %v1801_v11 = vadd.f32 %v2270_v39, %v2266_v37  ;;  %v1338_v16 = vadd.f32 %v1875_v32, %v1273_v56 }
 0x13e   :  { %v2324_v7 = vpop.f32.mrf.mxu1  ;;  %v2397_v51 = vld [vmem:[#allocation18_spill] sm:$0xff]  ;;  %v1847_v31 = vadd.f32 %v2322_v47, %v2318_v12 }
 0x13f   :  { %v1904_v9 = vpop.f32.mrf.mxu0  ;;  %v1270_v5 = vadd.f32 %v1832_v50, %v1205_v24  ;;  %v2392_v24 = vld [vmem:[#allocation11_spill] sm:$0xff]  ;;  %v1881_v41 = vadd.f32 %v2397_v51, %v2396_v42 }
 0x140   :  { %v1944_v1 = vpop.f32.mrf.mxu1  ;;  %v2398_v43 = vld [vmem:[#allocation19_spill] sm:$0xff] }
 0x141   :  { %v1905_v17 = vpop.f32.mrf.mxu0  ;;  %v1335_v15 = vadd.f32 %v1872_v53, %v1270_v5 }
 0x142   :  { %v1906_v20 = vadd.f32 %v1905_v17, %v1904_v9  ;;  %v1945_v21 = vpop.f32.mrf.mxu1  ;;  %v1841_v17 = vadd.f32 %v2306_v6, %v2302_v4  ;;  %v1878_v4 = vadd.f32 %v2391_v23, %v2390_v22  ;;  %v2401_v32 = vld [vmem:[#allocation22_spill] sm:$0xff] }
 0x143   :  { %v1907_v45 = vpop.f32.mrf.mxu0  ;;  %v1946_v8 = vadd.f32 %v1945_v21, %v1944_v1  ;;  %v1761_v1 = vadd.f32 %v2268_v38, %v2264_v36 }
 0x144   :  { %v1947_v52 = vpop.f32.mrf.mxu1  ;;  %v1392_v27 = vadd.f32 %v1906_v20, %v1327_v46  ;;  %v1343_v40 = vadd.f32 %v1878_v4, %v1278_v19 }
 0x145   :  { %v1908_v26 = vpop.f32.mrf.mxu0  ;;  %v1216_v39 = vadd.f32 %v1801_v11, %v1761_v1 }
 0x146   :  { %v1909_v49 = vadd.f32 %v1908_v26, %v1907_v45  ;;  %v1948_v44 = vpop.f32.mrf.mxu1  ;;  %v1457_v58 = vadd.f32 %v1946_v8, %v1392_v27  ;;  %v2393_v26 = vld [vmem:[#allocation13_spill] sm:$0xff]  ;;  %v2395_v27 = vld [vmem:[#allocation14_spill] sm:$0xff] }
 0x147   :  { %v1910_v3 = vpop.f32.mrf.mxu0  ;;  %v1949_v30 = vadd.f32 %v1948_v44, %v1947_v52  ;;  %v1281_v45 = vadd.f32 %v1841_v17, %v1216_v39 }
 0x148   :  { %v1395_v28 = vadd.f32 %v1909_v49, %v1330_v54  ;;  %v1950_v9 = vpop.f32.mrf.mxu1  ;;  %v1767_v54 = vadd.f32 %v2393_v26, %v2392_v24  ;;  %v1807_v49 = vadd.f32 %v2395_v27, %v2394_v25 }
 0x149   :  { %v1911_v55 = vpop.f32.mrf.mxu0  ;;  %v1346_v29 = vadd.f32 %v1881_v41, %v1281_v45 }
 0x14a   :  { %v1460_v60 = vadd.f32 %v1949_v30, %v1395_v28  ;;  %v1912_v62 = vadd.f32 %v1911_v55, %v1910_v3  ;;  %v1951_v10 = vpop.f32.mrf.mxu1  ;;  %v2399_v3 = vld [vmem:[#allocation21_spill] sm:$0xff]  ;;  %v1221_v30 = vadd.f32 %v1804_v2, %v1764_v0 }
 0x14b   :  { %v1913_v14 = vpop.f32.mrf.mxu0  ;;  %v1952_v20 = vadd.f32 %v1951_v10, %v1950_v9  ;;  %v1844_v5 = vadd.f32 %v2399_v3, %v2398_v43 }
 0x14c   :  { %v1708_v34 = vpack.c.bf16 %v1460_v60, %v1457_v58  ;;  %v1953_v35 = vpop.f32.mrf.mxu1  ;;  %v1400_v36 = vadd.f32 %v1912_v62, %v1335_v15  ;;  %v1224_v58 = vadd.f32 %v1807_v49, %v1767_v54  ;;  %v2400_v15 = vld [vmem:[#allocation20_spill] sm:$0xff] }
 0x14d   :  { %v1914_v59 = vpop.f32.mrf.mxu0  ;;  %v1286_v62 = vadd.f32 %v1844_v5, %v1221_v30  ;;  %v1884_v33 = vadd.f32 %v2401_v32, %v2400_v15 }
 0x14e   :  { %1709 = vst [vmem:[#allocation7] sm:$0xff] %v1708_v34   ;;  %v1915_v38 = vadd.f32 %v1914_v59, %v1913_v14  ;;  %v1954_v37 = vpop.f32.mrf.mxu1  ;;  %v1465_v46 = vadd.f32 %v1952_v20, %v1400_v36  ;;  %v1887_v36 = vadd.f32 %v2324_v7, %v2320_v13 }
 0x14f   :  { %v1916_v18 = vpop.f32.mrf.mxu0  ;;  %v1955_v63 = vadd.f32 %v1954_v37, %v1953_v35  ;;  %v1289_v35 = vadd.f32 %v1847_v31, %v1224_v58  ;;  %v1351_v17 = vadd.f32 %v1884_v33, %v1286_v62 }
 0x150   :  { %v1403_v61 = vadd.f32 %v1915_v38, %v1338_v16  ;;  %v1956_v21 = vpop.f32.mrf.mxu1 }
 0x151   :  { %v1917_v6 = vpop.f32.mrf.mxu0 }
 0x152   :  { %v1468_v48 = vadd.f32 %v1955_v63, %v1403_v61  ;;  %v1918_v50 = vadd.f32 %v1917_v6, %v1916_v18  ;;  %v1957_v52 = vpop.f32.mrf.mxu1  ;;  %v1354_v18 = vadd.f32 %v1887_v36, %v1289_v35 }
 0x153   :  { %v1919_v44 = vpop.f32.mrf.mxu0  ;;  %v1958_v10 = vadd.f32 %v1957_v52, %v1956_v21 }
 0x154   :  { %v1713_v8 = vpack.c.bf16 %v1468_v48, %v1465_v46  ;;  %v1959_v28 = vpop.f32.mrf.mxu1  ;;  %v1408_v53 = vadd.f32 %v1918_v50, %v1343_v40 }
 0x155   :  { %v1920_v9 = vpop.f32.mrf.mxu0 }
 0x156   :  { %1725 = vst [vmem:[#allocation7 + $0x8] sm:$0xff] %v1713_v8   ;;  %v1921_v55 = vadd.f32 %v1920_v9, %v1919_v44  ;;  %v1960_v56 = vpop.f32.mrf.mxu1  ;;  %v1473_v57 = vadd.f32 %v1958_v10, %v1408_v53 }
 0x157   :  { %v1922_v60 = vpop.f32.mrf.mxu0  ;;  %v1961_v11 = vadd.f32 %v1960_v56, %v1959_v28 }
 0x158   :  { %v1411_v1 = vadd.f32 %v1921_v55, %v1346_v29  ;;  %v1962_v14 = vpop.f32.mrf.mxu1 }
 0x159   :  { %v1923_v34 = vpop.f32.mrf.mxu0 }
 0x15a   :  { %v1476_v59 = vadd.f32 %v1961_v11, %v1411_v1  ;;  %v1924_v16 = vadd.f32 %v1923_v34, %v1922_v60  ;;  %v1963_v47 = vpop.f32.mrf.mxu1 }
 0x15b   :  { %v1925_v12 = vpop.f32.mrf.mxu0  ;;  %v1964_v63 = vadd.f32 %v1963_v47, %v1962_v14 }
 0x15c   :  { %v1718_v38 = vpack.c.bf16 %v1476_v59, %v1473_v57  ;;  %v1965_v37 = vpop.f32.mrf.mxu1  ;;  %v1416_v19 = vadd.f32 %v1924_v16, %v1351_v17 }
 0x15d   :  { %v1926_v39 = vpop.f32.mrf.mxu0 }
 0x15e   :  { %1726 = vst [vmem:[#allocation7 + $0x10] sm:$0xff] %v1718_v38   ;;  %v1927_v20 = vadd.f32 %v1926_v39, %v1925_v12  ;;  %v1966_v61 = vpop.f32.mrf.mxu1  ;;  %v1481_v2 = vadd.f32 %v1964_v63, %v1416_v19 }
 0x15f   :  { %v1967_v0 = vadd.f32 %v1966_v61, %v1965_v37 }
 0x160   :  { %v1419_v21 = vadd.f32 %v1927_v20, %v1354_v18 }
 0x162   :  { %v1484_v22 = vadd.f32 %v1967_v0, %v1419_v21 }
 0x164   :  { %v1723_v23 = vpack.c.bf16 %v1484_v22, %v1481_v2 }
 0x166   :  { %1727 = vst [vmem:[#allocation7 + $0x18] sm:$0xff] %v1723_v23  }
 0x167   :  { %2194 = shalt.err (!%p2191_p0)
}
 0x168   :  { %1538 = dma.vmem_to_hbm [thread:$0]  %s1533_s1, 512, %s2377_s2, [#allocation4], %s2213_s19, %s2213_s19, %s2214_s20  }
 0x169   :  { %2207 = dma.done.wait [#allocation4], 512  }
 0x16a   :  { %2208 = vsyncadd [#allocation4], 4294966784 }
 0x16b   :  { %1542 = vsyncpa [#allocation3], 1 }
 0x16c   :  { %1543 = vsyncpa [#allocation6], 1 }
 0x16d   :  { %1544 = vsyncpa [#allocation4], 1 }

</bundles_post_ra>
